<compile_context>
chip_gen: v6e
topology: v6e:2x2x1
jax: 0.10.0
libtpu: 0.0.40
codegen_flags: <defaults>
</compile_context>

<pallas_src>
import functools

import jax
import jax.numpy as jnp
from jax import lax
from jax.experimental import pallas as pl
from jax.experimental.pallas import tpu as pltpu

K_T = 9                    # temporal kernel size of unit_tcn
PAD_T = (K_T - 1) // 2     # = 4


def _gchb_kernel(x1_ref, x2_ref, mcat_ref, wg_ref, gsh_ref, wt_ref, tsh_ref,
                 o_ref, pad_ref, *, T, V):
    """One batch element per grid step.

    x1_ref : (1, T*C, V)  bf16   rows = (t, c), lanes = v   (graph aggregation)
    x2_ref : (1, C, T*V)  bf16   rows = c, lanes = (t, v)   (residuals / output)
    """
    C = x2_ref.shape[1]
    TV = T * V
    HALO = 128                      # lane-aligned temporal halo (>= PAD_T * V)

    # ---------------- GCHB graph aggregation: contract over V only.
    # One MXU dot with M = T*C rows against a tiny (V, 3V) adjacency concat.
    z = jnp.dot(x1_ref[0], mcat_ref[...],
                preferred_element_type=jnp.float32)          # (T*C, 3V) f32

    # Re-layout branch m from (t,c)-rows/(w)-lanes to a (C, T*V) slab using
    # static sublane-aligned slices + one lane concat (no row-stack of all 3).
    def branch(m):
        pieces = [z[t * C:(t + 1) * C, m * V:(m + 1) * V] for t in range(T)]
        return jnp.concatenate(pieces, axis=1).astype(jnp.bfloat16)  # (C, TV)

    x2 = x2_ref[0].astype(jnp.float32)                        # (C, TV) f32

    # ---------------- fused 1x1 convs: three accumulated dots (BN folded in wg)
    y = jnp.dot(wg_ref[0], branch(0), preferred_element_type=jnp.float32)
    y = y + jnp.dot(wg_ref[1], branch(1), preferred_element_type=jnp.float32)
    y = y + jnp.dot(wg_ref[2], branch(2), preferred_element_type=jnp.float32)
    g = jnp.maximum(y + gsh_ref[...] + x2, 0.0)               # bias/BN + res + ReLU

    # ---------------- unit_tcn: 9x1 temporal conv as 9 accumulated dots over a
    # time-padded scratch whose interior starts at lane 128 (aligned store).
    P = PAD_T * V
    pad_ref[:, 0:HALO] = jnp.zeros((C, HALO), pad_ref.dtype)
    pad_ref[:, HALO + TV:HALO + TV + HALO] = jnp.zeros((C, HALO), pad_ref.dtype)
    pad_ref[:, HALO:HALO + TV] = g.astype(pad_ref.dtype)

    tc = jnp.zeros((C, TV), jnp.float32)
    for k in range(K_T):
        off = HALO - P + k * V
        win = pad_ref[:, off:off + TV]                        # (C, TV) bf16, shifted
        tc = tc + jnp.dot(wt_ref[k], win, preferred_element_type=jnp.float32)

    # module residual (stride == 1 -> identity) + final ReLU, lane-dense store
    o_ref[0] = jnp.maximum(tc + tsh_ref[...] + x2, 0.0).astype(o_ref.dtype)


def _rep_spec(shape):
    zeros = (0,) * len(shape)
    return pl.BlockSpec(shape, lambda n, _z=zeros: _z)


def _pack_params(p):
    """Fold conv biases + eval-mode BN affines into weights / per-channel shifts."""
    mcat = jnp.concatenate([p["A"], p["B"], p["Cm"]], axis=1)            # (V, 3V)
    gs = p["gcn_scale"]
    wg3 = jnp.stack([gs[:, None] * p["wa"],
                     gs[:, None] * p["wb"],
                     gs[:, None] * p["wc"]], axis=0)                     # (3, C, C)
    gshift = (gs * (p["ba"] + p["bb"] + p["bc"]) + p["gcn_shift"])[:, None]  # (C, 1)
    ts = p["tcn_scale"]
    wt3 = p["wt"] * ts[None, :, None]                                    # (K_T, C, C)
    tshift = (ts * p["bt"] + p["tcn_shift"])[:, None]                    # (C, 1)
    return (mcat.astype(jnp.bfloat16), wg3.astype(jnp.bfloat16),
            gshift.astype(jnp.float32), wt3.astype(jnp.bfloat16),
            tshift.astype(jnp.float32))


def gchb_module_forward(x_nchw, p):
    """x_nchw: (N, C, T, V) float32 (PyTorch layout).  Returns same layout."""
    N, C, T, V = x_nchw.shape
    TV = T * V
    xb = x_nchw.astype(jnp.bfloat16)
    # Two wrapper-side views of x (layout plumbing; no in-kernel relayout of x):
    x_rows = jnp.transpose(xb, (0, 2, 1, 3)).reshape(N, T * C, V)  # rows=(t,c), lanes=v
    x_slab = xb.reshape(N, C, TV)                                  # rows=c, lanes=(t,v)

    mcat, wg3, gshift, wt3, tshift = _pack_params(p)

    kernel = functools.partial(_gchb_kernel, T=T, V=V)
    out = pl.pallas_call(
        kernel,
        out_shape=jax.ShapeDtypeStruct((N, C, TV), jnp.float32),
        grid_spec=pltpu.PrefetchScalarGridSpec(
            num_scalar_prefetch=0,
            grid=(N,),
            in_specs=[
                pl.BlockSpec((1, T * C, V), lambda n: (n, 0, 0)),  # x rows (agg)
                pl.BlockSpec((1, C, TV), lambda n: (n, 0, 0)),     # x slab (residuals)
                _rep_spec((V, 3 * V)),                             # [A|B|Cm]
                _rep_spec((3, C, C)),                              # gcn weights (BN folded)
                _rep_spec((C, 1)),                                 # gcn shift
                _rep_spec((K_T, C, C)),                            # tcn weights (BN folded)
                _rep_spec((C, 1)),                                 # tcn shift
            ],
            out_specs=pl.BlockSpec((1, C, TV), lambda n: (n, 0, 0)),
            scratch_shapes=[pltpu.VMEM((C, 2 * 128 + TV), jnp.bfloat16)],
        ),
        compiler_params=pltpu.CompilerParams(
            dimension_semantics=("parallel",),       # even batch grid -> both v7x TCs busy
            vmem_limit_bytes=48 * 1024 * 1024,       # headroom under v7x's 64 MiB/TC
        ),
    )(x_rows, x_slab, mcat, wg3, gshift, wt3, tshift)

    return out.reshape(N, C, T, V)


def reference_forward(x, p):
    """Pure-JAX (NCHW, f32) reference mirroring the PyTorch forward semantics."""
    N, C, T, V = x.shape
    hp = lax.Precision.HIGHEST

    def conv1x1(h, w, b):
        return jnp.einsum('nctv,oc->notv', h, w, precision=hp) + b[None, :, None, None]

    def bn(h, scale, shift):
        return h * scale[None, :, None, None] + shift[None, :, None, None]

    # GCHB
    y = (conv1x1(jnp.einsum('nctv,vw->nctw', x, p["A"], precision=hp), p["wa"], p["ba"])
         + conv1x1(jnp.einsum('nctv,vw->nctw', x, p["B"], precision=hp), p["wb"], p["bb"])
         + conv1x1(jnp.einsum('nctv,vw->nctw', x, p["Cm"], precision=hp), p["wc"], p["bc"]))
    g = jax.nn.relu(bn(y, p["gcn_scale"], p["gcn_shift"]) + x)

    # unit_tcn: Conv2d(kernel=(9,1), stride=1, pad=(4,0)) + BN
    gp = jnp.pad(g, ((0, 0), (0, 0), (PAD_T, PAD_T), (0, 0)))
    tc = sum(jnp.einsum('nctv,oc->notv', gp[:, :, k:k + T, :], p["wt"][k], precision=hp)
             for k in range(K_T))
    tc = bn(tc + p["bt"][None, :, None, None], p["tcn_scale"], p["tcn_shift"])

    # module residual (stride == 1 -> identity) + final ReLU
    return jax.nn.relu(tc + x)


def make_params(key, dim, V):
    ks = iter(jax.random.split(key, 20))

    def adj(k):
        return 0.5 * jnp.eye(V, dtype=jnp.float32) + 0.1 * jax.random.normal(k, (V, V), jnp.float32)

    def cw(k):
        return jax.random.normal(k, (dim, dim), jnp.float32) / jnp.sqrt(dim)

    def bn_affine(k):
        k1, k2, k3, k4 = jax.random.split(k, 4)
        gamma = 1.0 + 0.1 * jax.random.normal(k1, (dim,), jnp.float32)
        beta = 0.1 * jax.random.normal(k2, (dim,), jnp.float32)
        mean = 0.05 * jax.random.normal(k3, (dim,), jnp.float32)
        var = 1.0 + 0.1 * jnp.abs(jax.random.normal(k4, (dim,), jnp.float32))
        scale = gamma / jnp.sqrt(var + 1e-5)
        shift = beta - mean * scale
        return scale, shift

    gsc, gsh = bn_affine(next(ks))
    tsc, tsh = bn_affine(next(ks))
    return dict(
        A=adj(next(ks)), B=adj(next(ks)), Cm=adj(next(ks)),
        wa=cw(next(ks)), ba=0.1 * jax.random.normal(next(ks), (dim,), jnp.float32),
        wb=cw(next(ks)), bb=0.1 * jax.random.normal(next(ks), (dim,), jnp.float32),
        wc=cw(next(ks)), bc=0.1 * jax.random.normal(next(ks), (dim,), jnp.float32),
        gcn_scale=gsc, gcn_shift=gsh,
        wt=jax.random.normal(next(ks), (K_T, dim, dim), jnp.float32) / jnp.sqrt(dim * K_T),
        bt=0.1 * jax.random.normal(next(ks), (dim,), jnp.float32),
        tcn_scale=tsc, tcn_shift=tsh,
    )


if __name__ == "__main__":
    N, dim, T, V = 2, 8, 8, 16                    # batch, channels, frames, joints
    key = jax.random.PRNGKey(0)
    kx, kp = jax.random.split(key)
    x = jax.random.normal(kx, (N, dim, T, V), jnp.float32)   # NCHW = (N, C, T, V)
    params = make_params(kp, dim, V)

    out = jax.block_until_ready(gchb_module_forward(x, params))
    ref = jax.block_until_ready(reference_forward(x, params))

    assert out.shape == x.shape, (out.shape, x.shape)
    assert bool(jnp.all(jnp.isfinite(out)))
    err = float(jnp.max(jnp.abs(out - ref)))
    # bf16 matmul operands with f32 accumulation -> relaxed tolerance vs f32 ref
    assert bool(jnp.allclose(out, ref, atol=5e-2, rtol=5e-2)), err
    print("KERNEL_OK")
</pallas_src>

<mosaic_0001>
module attributes {stable_mosaic.version = 11 : i64} {
  func.func @_gchb_kernel(%arg0: i32, %arg1: memref<1x64x16xbf16, #tpu.memory_space<vmem>>, %arg2: memref<1x8x128xbf16, #tpu.memory_space<vmem>>, %arg3: memref<16x48xbf16, #tpu.memory_space<vmem>>, %arg4: memref<3x8x8xbf16, #tpu.memory_space<vmem>>, %arg5: memref<8x1xf32, #tpu.memory_space<vmem>>, %arg6: memref<9x8x8xbf16, #tpu.memory_space<vmem>>, %arg7: memref<8x1xf32, #tpu.memory_space<vmem>>, %arg8: memref<1x8x128xf32, #tpu.memory_space<vmem>>, %arg9: memref<8x384xbf16, #tpu.memory_space<vmem>>) attributes {dimension_semantics = [#tpu.dimension_semantics<parallel>], iteration_bounds = array<i64: 2>, scalar_prefetch = 0 : i64, scratch_operands = 1 : i64, tpu.core_type = #tpu.core_type<tc>, window_params = [{transform_indices = @transform_0, window_bounds = array<i64: 1, 64, 16>}, {transform_indices = @transform_1, window_bounds = array<i64: 1, 8, 128>}, {pipeline_mode = #tpu.pipeline_mode<synchronous>, transform_indices = @transform_2, window_bounds = array<i64: 16, 48>}, {pipeline_mode = #tpu.pipeline_mode<synchronous>, transform_indices = @transform_3, window_bounds = array<i64: 3, 8, 8>}, {pipeline_mode = #tpu.pipeline_mode<synchronous>, transform_indices = @transform_4, window_bounds = array<i64: 8, 1>}, {pipeline_mode = #tpu.pipeline_mode<synchronous>, transform_indices = @transform_5, window_bounds = array<i64: 9, 8, 8>}, {pipeline_mode = #tpu.pipeline_mode<synchronous>, transform_indices = @transform_6, window_bounds = array<i64: 8, 1>}, {transform_indices = @transform_7, window_bounds = array<i64: 1, 8, 128>}]} {
    %c0 = arith.constant 0 : index
    %c0_0 = arith.constant 0 : index
    %c0_1 = arith.constant 0 : index
    %0 = vector.load %arg1[%c0, %c0_0, %c0_1] : memref<1x64x16xbf16, #tpu.memory_space<vmem>>, vector<1x64x16xbf16>
    %1 = vector.shape_cast %0 : vector<1x64x16xbf16> to vector<64x16xbf16>
    %c0_2 = arith.constant 0 : index
    %c0_3 = arith.constant 0 : index
    %2 = vector.load %arg3[%c0_2, %c0_3] : memref<16x48xbf16, #tpu.memory_space<vmem>>, vector<16x48xbf16>
    %cst = arith.constant dense<0.000000e+00> : vector<64x48xf32>
    %3 = tpu.matmul %1, %2, %cst {dimension_numbers = #tpu.dot_dimension_numbers<[1], [0], [0], [1], [0, 0, 1, 1], [], []>} : vector<64x16xbf16>, vector<16x48xbf16>, vector<64x48xf32> -> vector<64x48xf32>
    %c0_4 = arith.constant 0 : index
    %c0_5 = arith.constant 0 : index
    %c0_6 = arith.constant 0 : index
    %4 = vector.load %arg2[%c0_4, %c0_5, %c0_6] : memref<1x8x128xbf16, #tpu.memory_space<vmem>>, vector<1x8x128xbf16>
    %5 = vector.shape_cast %4 : vector<1x8x128xbf16> to vector<8x128xbf16>
    %6 = arith.extf %5 : vector<8x128xbf16> to vector<8x128xf32>
    %c0_7 = arith.constant 0 : index
    %c0_8 = arith.constant 0 : index
    %c0_9 = arith.constant 0 : index
    %7 = vector.load %arg4[%c0_7, %c0_8, %c0_9] : memref<3x8x8xbf16, #tpu.memory_space<vmem>>, vector<1x8x8xbf16>
    %8 = vector.shape_cast %7 : vector<1x8x8xbf16> to vector<8x8xbf16>
    %9 = vector.extract_strided_slice %3 {offsets = [0, 0], sizes = [8, 16], strides = [1, 1]} : vector<64x48xf32> to vector<8x16xf32>
    %10 = vector.extract_strided_slice %3 {offsets = [8, 0], sizes = [8, 16], strides = [1, 1]} : vector<64x48xf32> to vector<8x16xf32>
    %11 = vector.extract_strided_slice %3 {offsets = [16, 0], sizes = [8, 16], strides = [1, 1]} : vector<64x48xf32> to vector<8x16xf32>
    %12 = vector.extract_strided_slice %3 {offsets = [24, 0], sizes = [8, 16], strides = [1, 1]} : vector<64x48xf32> to vector<8x16xf32>
    %13 = vector.extract_strided_slice %3 {offsets = [32, 0], sizes = [8, 16], strides = [1, 1]} : vector<64x48xf32> to vector<8x16xf32>
    %14 = vector.extract_strided_slice %3 {offsets = [40, 0], sizes = [8, 16], strides = [1, 1]} : vector<64x48xf32> to vector<8x16xf32>
    %15 = vector.extract_strided_slice %3 {offsets = [48, 0], sizes = [8, 16], strides = [1, 1]} : vector<64x48xf32> to vector<8x16xf32>
    %16 = vector.extract_strided_slice %3 {offsets = [56, 0], sizes = [8, 16], strides = [1, 1]} : vector<64x48xf32> to vector<8x16xf32>
    %17 = tpu.concatenate %9, %10, %11, %12, %13, %14, %15, %16 in 1 : vector<8x16xf32>, vector<8x16xf32>, vector<8x16xf32>, vector<8x16xf32>, vector<8x16xf32>, vector<8x16xf32>, vector<8x16xf32>, vector<8x16xf32> -> vector<8x128xf32>
    %18 = arith.truncf %17 : vector<8x128xf32> to vector<8x128xbf16>
    %cst_10 = arith.constant dense<0.000000e+00> : vector<8x128xf32>
    %19 = tpu.matmul %8, %18, %cst_10 {dimension_numbers = #tpu.dot_dimension_numbers<[1], [0], [0], [1], [0, 0, 1, 1], [], []>} : vector<8x8xbf16>, vector<8x128xbf16>, vector<8x128xf32> -> vector<8x128xf32>
    %c1 = arith.constant 1 : index
    %c0_11 = arith.constant 0 : index
    %c0_12 = arith.constant 0 : index
    %20 = vector.load %arg4[%c1, %c0_11, %c0_12] : memref<3x8x8xbf16, #tpu.memory_space<vmem>>, vector<1x8x8xbf16>
    %21 = vector.shape_cast %20 : vector<1x8x8xbf16> to vector<8x8xbf16>
    %22 = vector.extract_strided_slice %3 {offsets = [0, 16], sizes = [8, 16], strides = [1, 1]} : vector<64x48xf32> to vector<8x16xf32>
    %23 = vector.extract_strided_slice %3 {offsets = [8, 16], sizes = [8, 16], strides = [1, 1]} : vector<64x48xf32> to vector<8x16xf32>
    %24 = vector.extract_strided_slice %3 {offsets = [16, 16], sizes = [8, 16], strides = [1, 1]} : vector<64x48xf32> to vector<8x16xf32>
    %25 = vector.extract_strided_slice %3 {offsets = [24, 16], sizes = [8, 16], strides = [1, 1]} : vector<64x48xf32> to vector<8x16xf32>
    %26 = vector.extract_strided_slice %3 {offsets = [32, 16], sizes = [8, 16], strides = [1, 1]} : vector<64x48xf32> to vector<8x16xf32>
    %27 = vector.extract_strided_slice %3 {offsets = [40, 16], sizes = [8, 16], strides = [1, 1]} : vector<64x48xf32> to vector<8x16xf32>
    %28 = vector.extract_strided_slice %3 {offsets = [48, 16], sizes = [8, 16], strides = [1, 1]} : vector<64x48xf32> to vector<8x16xf32>
    %29 = vector.extract_strided_slice %3 {offsets = [56, 16], sizes = [8, 16], strides = [1, 1]} : vector<64x48xf32> to vector<8x16xf32>
    %30 = tpu.concatenate %22, %23, %24, %25, %26, %27, %28, %29 in 1 : vector<8x16xf32>, vector<8x16xf32>, vector<8x16xf32>, vector<8x16xf32>, vector<8x16xf32>, vector<8x16xf32>, vector<8x16xf32>, vector<8x16xf32> -> vector<8x128xf32>
    %31 = arith.truncf %30 : vector<8x128xf32> to vector<8x128xbf16>
    %cst_13 = arith.constant dense<0.000000e+00> : vector<8x128xf32>
    %32 = tpu.matmul %21, %31, %cst_13 {dimension_numbers = #tpu.dot_dimension_numbers<[1], [0], [0], [1], [0, 0, 1, 1], [], []>} : vector<8x8xbf16>, vector<8x128xbf16>, vector<8x128xf32> -> vector<8x128xf32>
    %33 = arith.addf %19, %32 : vector<8x128xf32>
    %c2 = arith.constant 2 : index
    %c0_14 = arith.constant 0 : index
    %c0_15 = arith.constant 0 : index
    %34 = vector.load %arg4[%c2, %c0_14, %c0_15] : memref<3x8x8xbf16, #tpu.memory_space<vmem>>, vector<1x8x8xbf16>
    %35 = vector.shape_cast %34 : vector<1x8x8xbf16> to vector<8x8xbf16>
    %36 = vector.extract_strided_slice %3 {offsets = [0, 32], sizes = [8, 16], strides = [1, 1]} : vector<64x48xf32> to vector<8x16xf32>
    %37 = vector.extract_strided_slice %3 {offsets = [8, 32], sizes = [8, 16], strides = [1, 1]} : vector<64x48xf32> to vector<8x16xf32>
    %38 = vector.extract_strided_slice %3 {offsets = [16, 32], sizes = [8, 16], strides = [1, 1]} : vector<64x48xf32> to vector<8x16xf32>
    %39 = vector.extract_strided_slice %3 {offsets = [24, 32], sizes = [8, 16], strides = [1, 1]} : vector<64x48xf32> to vector<8x16xf32>
    %40 = vector.extract_strided_slice %3 {offsets = [32, 32], sizes = [8, 16], strides = [1, 1]} : vector<64x48xf32> to vector<8x16xf32>
    %41 = vector.extract_strided_slice %3 {offsets = [40, 32], sizes = [8, 16], strides = [1, 1]} : vector<64x48xf32> to vector<8x16xf32>
    %42 = vector.extract_strided_slice %3 {offsets = [48, 32], sizes = [8, 16], strides = [1, 1]} : vector<64x48xf32> to vector<8x16xf32>
    %43 = vector.extract_strided_slice %3 {offsets = [56, 32], sizes = [8, 16], strides = [1, 1]} : vector<64x48xf32> to vector<8x16xf32>
    %44 = tpu.concatenate %36, %37, %38, %39, %40, %41, %42, %43 in 1 : vector<8x16xf32>, vector<8x16xf32>, vector<8x16xf32>, vector<8x16xf32>, vector<8x16xf32>, vector<8x16xf32>, vector<8x16xf32>, vector<8x16xf32> -> vector<8x128xf32>
    %45 = arith.truncf %44 : vector<8x128xf32> to vector<8x128xbf16>
    %cst_16 = arith.constant dense<0.000000e+00> : vector<8x128xf32>
    %46 = tpu.matmul %35, %45, %cst_16 {dimension_numbers = #tpu.dot_dimension_numbers<[1], [0], [0], [1], [0, 0, 1, 1], [], []>} : vector<8x8xbf16>, vector<8x128xbf16>, vector<8x128xf32> -> vector<8x128xf32>
    %47 = arith.addf %33, %46 : vector<8x128xf32>
    %c0_17 = arith.constant 0 : index
    %c0_18 = arith.constant 0 : index
    %48 = vector.load %arg5[%c0_17, %c0_18] : memref<8x1xf32, #tpu.memory_space<vmem>>, vector<8x1xf32>
    %49 = vector.broadcast %48 : vector<8x1xf32> to vector<8x128xf32>
    %50 = arith.addf %47, %49 : vector<8x128xf32>
    %51 = arith.addf %50, %6 : vector<8x128xf32>
    %cst_19 = arith.constant 0.000000e+00 : f32
    %52 = vector.broadcast %cst_19 : f32 to vector<8x128xf32>
    %53 = arith.maximumf %51, %52 : vector<8x128xf32>
    %cst_20 = arith.constant 0.000000e+00 : bf16
    %54 = vector.broadcast %cst_20 : bf16 to vector<8x128xbf16>
    %c0_21 = arith.constant 0 : index
    %c0_22 = arith.constant 0 : index
    %55 = vector.load %arg9[%c0_21, %c0_22] : memref<8x384xbf16, #tpu.memory_space<vmem>>, vector<8x128xbf16>
    tpu.vector_store %arg9[%c0_21, %c0_22], %54 {strides = array<i32>} : memref<8x384xbf16, #tpu.memory_space<vmem>>, vector<8x128xbf16>,
    %cst_23 = arith.constant 0.000000e+00 : bf16
    %56 = vector.broadcast %cst_23 : bf16 to vector<8x128xbf16>
    %c0_24 = arith.constant 0 : index
    %c256 = arith.constant 256 : index
    %57 = vector.load %arg9[%c0_24, %c256] : memref<8x384xbf16, #tpu.memory_space<vmem>>, vector<8x128xbf16>
    tpu.vector_store %arg9[%c0_24, %c256], %56 {strides = array<i32>} : memref<8x384xbf16, #tpu.memory_space<vmem>>, vector<8x128xbf16>,
    %58 = arith.truncf %53 : vector<8x128xf32> to vector<8x128xbf16>
    %c0_25 = arith.constant 0 : index
    %c128 = arith.constant 128 : index
    %59 = vector.load %arg9[%c0_25, %c128] : memref<8x384xbf16, #tpu.memory_space<vmem>>, vector<8x128xbf16>
    tpu.vector_store %arg9[%c0_25, %c128], %58 {strides = array<i32>} : memref<8x384xbf16, #tpu.memory_space<vmem>>, vector<8x128xbf16>,
    %cst_26 = arith.constant 0.000000e+00 : f32
    %60 = vector.broadcast %cst_26 : f32 to vector<8x128xf32>
    %c0_27 = arith.constant 0 : index
    %c64 = arith.constant 64 : index
    %61 = vector.load %arg9[%c0_27, %c64] : memref<8x384xbf16, #tpu.memory_space<vmem>>, vector<8x128xbf16>
    %c0_28 = arith.constant 0 : index
    %c0_29 = arith.constant 0 : index
    %c0_30 = arith.constant 0 : index
    %62 = vector.load %arg6[%c0_28, %c0_29, %c0_30] : memref<9x8x8xbf16, #tpu.memory_space<vmem>>, vector<1x8x8xbf16>
    %63 = vector.shape_cast %62 : vector<1x8x8xbf16> to vector<8x8xbf16>
    %cst_31 = arith.constant dense<0.000000e+00> : vector<8x128xf32>
    %64 = tpu.matmul %63, %61, %cst_31 {dimension_numbers = #tpu.dot_dimension_numbers<[1], [0], [0], [1], [0, 0, 1, 1], [], []>} : vector<8x8xbf16>, vector<8x128xbf16>, vector<8x128xf32> -> vector<8x128xf32>
    %65 = arith.addf %60, %64 : vector<8x128xf32>
    %c0_32 = arith.constant 0 : index
    %c80 = arith.constant 80 : index
    %66 = vector.load %arg9[%c0_32, %c80] : memref<8x384xbf16, #tpu.memory_space<vmem>>, vector<8x128xbf16>
    %c1_33 = arith.constant 1 : index
    %c0_34 = arith.constant 0 : index
    %c0_35 = arith.constant 0 : index
    %67 = vector.load %arg6[%c1_33, %c0_34, %c0_35] : memref<9x8x8xbf16, #tpu.memory_space<vmem>>, vector<1x8x8xbf16>
    %68 = vector.shape_cast %67 : vector<1x8x8xbf16> to vector<8x8xbf16>
    %cst_36 = arith.constant dense<0.000000e+00> : vector<8x128xf32>
    %69 = tpu.matmul %68, %66, %cst_36 {dimension_numbers = #tpu.dot_dimension_numbers<[1], [0], [0], [1], [0, 0, 1, 1], [], []>} : vector<8x8xbf16>, vector<8x128xbf16>, vector<8x128xf32> -> vector<8x128xf32>
    %70 = arith.addf %65, %69 : vector<8x128xf32>
    %c0_37 = arith.constant 0 : index
    %c96 = arith.constant 96 : index
    %71 = vector.load %arg9[%c0_37, %c96] : memref<8x384xbf16, #tpu.memory_space<vmem>>, vector<8x128xbf16>
    %c2_38 = arith.constant 2 : index
    %c0_39 = arith.constant 0 : index
    %c0_40 = arith.constant 0 : index
    %72 = vector.load %arg6[%c2_38, %c0_39, %c0_40] : memref<9x8x8xbf16, #tpu.memory_space<vmem>>, vector<1x8x8xbf16>
    %73 = vector.shape_cast %72 : vector<1x8x8xbf16> to vector<8x8xbf16>
    %cst_41 = arith.constant dense<0.000000e+00> : vector<8x128xf32>
    %74 = tpu.matmul %73, %71, %cst_41 {dimension_numbers = #tpu.dot_dimension_numbers<[1], [0], [0], [1], [0, 0, 1, 1], [], []>} : vector<8x8xbf16>, vector<8x128xbf16>, vector<8x128xf32> -> vector<8x128xf32>
    %75 = arith.addf %70, %74 : vector<8x128xf32>
    %c0_42 = arith.constant 0 : index
    %c112 = arith.constant 112 : index
    %76 = vector.load %arg9[%c0_42, %c112] : memref<8x384xbf16, #tpu.memory_space<vmem>>, vector<8x128xbf16>
    %c3 = arith.constant 3 : index
    %c0_43 = arith.constant 0 : index
    %c0_44 = arith.constant 0 : index
    %77 = vector.load %arg6[%c3, %c0_43, %c0_44] : memref<9x8x8xbf16, #tpu.memory_space<vmem>>, vector<1x8x8xbf16>
    %78 = vector.shape_cast %77 : vector<1x8x8xbf16> to vector<8x8xbf16>
    %cst_45 = arith.constant dense<0.000000e+00> : vector<8x128xf32>
    %79 = tpu.matmul %78, %76, %cst_45 {dimension_numbers = #tpu.dot_dimension_numbers<[1], [0], [0], [1], [0, 0, 1, 1], [], []>} : vector<8x8xbf16>, vector<8x128xbf16>, vector<8x128xf32> -> vector<8x128xf32>
    %80 = arith.addf %75, %79 : vector<8x128xf32>
    %c0_46 = arith.constant 0 : index
    %c128_47 = arith.constant 128 : index
    %81 = vector.load %arg9[%c0_46, %c128_47] : memref<8x384xbf16, #tpu.memory_space<vmem>>, vector<8x128xbf16>
    %c4 = arith.constant 4 : index
    %c0_48 = arith.constant 0 : index
    %c0_49 = arith.constant 0 : index
    %82 = vector.load %arg6[%c4, %c0_48, %c0_49] : memref<9x8x8xbf16, #tpu.memory_space<vmem>>, vector<1x8x8xbf16>
    %83 = vector.shape_cast %82 : vector<1x8x8xbf16> to vector<8x8xbf16>
    %cst_50 = arith.constant dense<0.000000e+00> : vector<8x128xf32>
    %84 = tpu.matmul %83, %81, %cst_50 {dimension_numbers = #tpu.dot_dimension_numbers<[1], [0], [0], [1], [0, 0, 1, 1], [], []>} : vector<8x8xbf16>, vector<8x128xbf16>, vector<8x128xf32> -> vector<8x128xf32>
    %85 = arith.addf %80, %84 : vector<8x128xf32>
    %c0_51 = arith.constant 0 : index
    %c144 = arith.constant 144 : index
    %86 = vector.load %arg9[%c0_51, %c144] : memref<8x384xbf16, #tpu.memory_space<vmem>>, vector<8x128xbf16>
    %c5 = arith.constant 5 : index
    %c0_52 = arith.constant 0 : index
    %c0_53 = arith.constant 0 : index
    %87 = vector.load %arg6[%c5, %c0_52, %c0_53] : memref<9x8x8xbf16, #tpu.memory_space<vmem>>, vector<1x8x8xbf16>
    %88 = vector.shape_cast %87 : vector<1x8x8xbf16> to vector<8x8xbf16>
    %cst_54 = arith.constant dense<0.000000e+00> : vector<8x128xf32>
    %89 = tpu.matmul %88, %86, %cst_54 {dimension_numbers = #tpu.dot_dimension_numbers<[1], [0], [0], [1], [0, 0, 1, 1], [], []>} : vector<8x8xbf16>, vector<8x128xbf16>, vector<8x128xf32> -> vector<8x128xf32>
    %90 = arith.addf %85, %89 : vector<8x128xf32>
    %c0_55 = arith.constant 0 : index
    %c160 = arith.constant 160 : index
    %91 = vector.load %arg9[%c0_55, %c160] : memref<8x384xbf16, #tpu.memory_space<vmem>>, vector<8x128xbf16>
    %c6 = arith.constant 6 : index
    %c0_56 = arith.constant 0 : index
    %c0_57 = arith.constant 0 : index
    %92 = vector.load %arg6[%c6, %c0_56, %c0_57] : memref<9x8x8xbf16, #tpu.memory_space<vmem>>, vector<1x8x8xbf16>
    %93 = vector.shape_cast %92 : vector<1x8x8xbf16> to vector<8x8xbf16>
    %cst_58 = arith.constant dense<0.000000e+00> : vector<8x128xf32>
    %94 = tpu.matmul %93, %91, %cst_58 {dimension_numbers = #tpu.dot_dimension_numbers<[1], [0], [0], [1], [0, 0, 1, 1], [], []>} : vector<8x8xbf16>, vector<8x128xbf16>, vector<8x128xf32> -> vector<8x128xf32>
    %95 = arith.addf %90, %94 : vector<8x128xf32>
    %c0_59 = arith.constant 0 : index
    %c176 = arith.constant 176 : index
    %96 = vector.load %arg9[%c0_59, %c176] : memref<8x384xbf16, #tpu.memory_space<vmem>>, vector<8x128xbf16>
    %c7 = arith.constant 7 : index
    %c0_60 = arith.constant 0 : index
    %c0_61 = arith.constant 0 : index
    %97 = vector.load %arg6[%c7, %c0_60, %c0_61] : memref<9x8x8xbf16, #tpu.memory_space<vmem>>, vector<1x8x8xbf16>
    %98 = vector.shape_cast %97 : vector<1x8x8xbf16> to vector<8x8xbf16>
    %cst_62 = arith.constant dense<0.000000e+00> : vector<8x128xf32>
    %99 = tpu.matmul %98, %96, %cst_62 {dimension_numbers = #tpu.dot_dimension_numbers<[1], [0], [0], [1], [0, 0, 1, 1], [], []>} : vector<8x8xbf16>, vector<8x128xbf16>, vector<8x128xf32> -> vector<8x128xf32>
    %100 = arith.addf %95, %99 : vector<8x128xf32>
    %c0_63 = arith.constant 0 : index
    %c192 = arith.constant 192 : index
    %101 = vector.load %arg9[%c0_63, %c192] : memref<8x384xbf16, #tpu.memory_space<vmem>>, vector<8x128xbf16>
    %c8 = arith.constant 8 : index
    %c0_64 = arith.constant 0 : index
    %c0_65 = arith.constant 0 : index
    %102 = vector.load %arg6[%c8, %c0_64, %c0_65] : memref<9x8x8xbf16, #tpu.memory_space<vmem>>, vector<1x8x8xbf16>
    %103 = vector.shape_cast %102 : vector<1x8x8xbf16> to vector<8x8xbf16>
    %cst_66 = arith.constant dense<0.000000e+00> : vector<8x128xf32>
    %104 = tpu.matmul %103, %101, %cst_66 {dimension_numbers = #tpu.dot_dimension_numbers<[1], [0], [0], [1], [0, 0, 1, 1], [], []>} : vector<8x8xbf16>, vector<8x128xbf16>, vector<8x128xf32> -> vector<8x128xf32>
    %105 = arith.addf %100, %104 : vector<8x128xf32>
    %c0_67 = arith.constant 0 : index
    %c0_68 = arith.constant 0 : index
    %106 = vector.load %arg7[%c0_67, %c0_68] : memref<8x1xf32, #tpu.memory_space<vmem>>, vector<8x1xf32>
    %107 = vector.broadcast %106 : vector<8x1xf32> to vector<8x128xf32>
    %108 = arith.addf %105, %107 : vector<8x128xf32>
    %109 = arith.addf %108, %6 : vector<8x128xf32>
    %cst_69 = arith.constant 0.000000e+00 : f32
    %110 = vector.broadcast %cst_69 : f32 to vector<8x128xf32>
    %111 = arith.maximumf %109, %110 : vector<8x128xf32>
    %c0_70 = arith.constant 0 : index
    %c0_71 = arith.constant 0 : index
    %c0_72 = arith.constant 0 : index
    %112 = vector.load %arg8[%c0_70, %c0_71, %c0_72] : memref<1x8x128xf32, #tpu.memory_space<vmem>>, vector<1x8x128xf32>
    %113 = vector.shape_cast %112 : vector<1x8x128xf32> to vector<8x128xf32>
    %114 = vector.shape_cast %111 : vector<8x128xf32> to vector<1x8x128xf32>
    tpu.vector_store %arg8[%c0_70, %c0_71, %c0_72], %114 {strides = array<i32>} : memref<1x8x128xf32, #tpu.memory_space<vmem>>, vector<1x8x128xf32>,
    return
  }
  func.func @transform_0(%arg0: i32) -> (i32, i32, i32) {
    %c0_i32 = arith.constant 0 : i32
    %c0_i32_0 = arith.constant 0 : i32
    %c0_i32_1 = arith.constant 0 : i32
    return %arg0, %c0_i32, %c0_i32_0 : i32, i32, i32
  }
  func.func @transform_1(%arg0: i32) -> (i32, i32, i32) {
    %c0_i32 = arith.constant 0 : i32
    %c0_i32_0 = arith.constant 0 : i32
    %c0_i32_1 = arith.constant 0 : i32
    return %arg0, %c0_i32, %c0_i32_0 : i32, i32, i32
  }
  func.func @transform_2(%arg0: i32) -> (i32, i32) {
    %c0_i32 = arith.constant 0 : i32
    %c0_i32_0 = arith.constant 0 : i32
    %c0_i32_1 = arith.constant 0 : i32
    return %c0_i32, %c0_i32_0 : i32, i32
  }
  func.func @transform_3(%arg0: i32) -> (i32, i32, i32) {
    %c0_i32 = arith.constant 0 : i32
    %c0_i32_0 = arith.constant 0 : i32
    %c0_i32_1 = arith.constant 0 : i32
    %c0_i32_2 = arith.constant 0 : i32
    return %c0_i32, %c0_i32_0, %c0_i32_1 : i32, i32, i32
  }
  func.func @transform_4(%arg0: i32) -> (i32, i32) {
    %c0_i32 = arith.constant 0 : i32
    %c0_i32_0 = arith.constant 0 : i32
    %c0_i32_1 = arith.constant 0 : i32
    return %c0_i32, %c0_i32_0 : i32, i32
  }
  func.func @transform_5(%arg0: i32) -> (i32, i32, i32) {
    %c0_i32 = arith.constant 0 : i32
    %c0_i32_0 = arith.constant 0 : i32
    %c0_i32_1 = arith.constant 0 : i32
    %c0_i32_2 = arith.constant 0 : i32
    return %c0_i32, %c0_i32_0, %c0_i32_1 : i32, i32, i32
  }
  func.func @transform_6(%arg0: i32) -> (i32, i32) {
    %c0_i32 = arith.constant 0 : i32
    %c0_i32_0 = arith.constant 0 : i32
    %c0_i32_1 = arith.constant 0 : i32
    return %c0_i32, %c0_i32_0 : i32, i32
  }
  func.func @transform_7(%arg0: i32) -> (i32, i32, i32) {
    %c0_i32 = arith.constant 0 : i32
    %c0_i32_0 = arith.constant 0 : i32
    %c0_i32_1 = arith.constant 0 : i32
    return %arg0, %c0_i32, %c0_i32_0 : i32, i32, i32
  }
}

</mosaic_0001>

<bundles_post_ra>
// kernel: tpu_custom_call.1
= control target key start
LH: loop header
LB: loop body
LE: loop exit
PB: predicated region body
PF: predicated region fallthrough
CT: control target
= control target key end

     0   :  { %12 = vsyncpa [#allocation4], 0  ;;  %s1904_s0 = inlined_call_operand.vmem [shape: bf16[2,64,16], index: 0, kind: input, shape index: {}]   ;;  %s1905_s1 = inlined_call_operand.vmem [shape: bf16[2,8,128], index: 1, kind: input, shape index: {}]   ;;  %s1906_s2 = inlined_call_operand.vmem [shape: bf16[16,48], index: 2, kind: input, shape index: {}]   ;;  %s1907_s3 = inlined_call_operand.vmem [shape: bf16[3,8,8], index: 3, kind: input, shape index: {}]   ;;  %s1908_s4 = inlined_call_operand.vmem [shape: f32[8,1], index: 4, kind: input, shape index: {}]   ;;  %s1909_s5 = inlined_call_operand.vmem [shape: bf16[9,8,8], index: 5, kind: input, shape index: {}]   ;;  %s1910_s6 = inlined_call_operand.vmem [shape: f32[8,1], index: 6, kind: input, shape index: {}]   ;;  %s1911_s7 = inlined_call_operand.hbm [shape: f32[2,8,128], index: 7, kind: output, shape index: {}]  }
   0x1   :  { %14 = vsyncpa [#allocation4 + $0x1], 0  ;;  %s1630_s24 = smov 0   ;;  %s1632_s25 = smov 0  }
   0x2   :  { %s1634_s26 = smov 0   ;;  %s1636_s27 = smov 0  }
   0x3 LB: > { %s1651_s28 = sadd.s32 4294967295, %s1577_s27   ;;  %s1264_s29 = sadd.s32 4294967294, %s1577_s27   ;;  %s1577_s27 = sphi %s1636_s27, %s1917_s27   ;;  %s1573_s26 = sphi %s1634_s26, %s1916_s26   ;;  %s1569_s25 = sphi %s1632_s25, %s1915_s25   ;;  %s1565_s24 = sphi %s1630_s24, %s1914_s24  }
   0x4   : > { %s1655_s30 = sadd.s32 1, %s1577_s27   ;;  %s184_s8 = sadd.s32 1, %s1573_s26 }
   0x5   : > { %s181_s9 = ssub.s32 %s1577_s27, %s1655_s30  ;;  %p194_p0 = scmp.ne.s32.totalorder %s1573_s26, %s1569_s25 }
   0x6   : > { %p182_p1 = scmp.eq.s32.totalorder %s181_s9, 0  ;;  %p195_p2 = scmp.eq.s32.totalorder %s1651_s28, 1 }
   0x7   : > { %p200_p3 = scmp.ne.s32.totalorder %s1569_s25, %s1565_s24  ;;  %p201_p4 = scmp.eq.s32.totalorder %s1264_s29, 1 }
   0x8   : > { %s1666_s10 = scalar_select %p182_p1, %s1573_s26, %s184_s8  }
   0x9   : > { %p1668_p5 = por %p195_p2, %p194_p0  ;;  %p1672_p6 = por %p201_p4, %p200_p3 }
   0xa   : > { %p1267_p7 = scmp.ge.s32.totalorder %s1577_s27, 1  ;;  %p249_p8 = scmp.lt.s32.totalorder %s1577_s27, 3 }
   0xc   : > { %p250_p9 = pnand %p1267_p7, %p249_p8 }
   0xd   : > { %p285_p10 = scmp.lt.s32.totalorder (!%p250_p9), %s1651_s28, 1  ;;  %s1579_s20 = smov (!%p250_p9), 32  }
   0xe   : > { %253 = sbr.rel (%p250_p9) target bundleno = 957 (0x3bd), region = 48  ;;  %s1580_s21 = smov (!%p250_p9), 112  }
   0xf   : > { %s1581_s22 = smov (!%p250_p9), 16   ;;  %s1582_s23 = smov (!%p250_p9), 48  }
  0x10   : > { %s1584_s29 = smov (!%p250_p9), 96   ;;  %s1586_s8 = smov (!%p250_p9), 80  }
  0x11   : > { %s1587_s9 = smov (!%p250_p9), 64   ;;  %s1308_s13 = sshll.u32 (!%p250_p9), %s1651_s28, 7 }
  0x13   : > { %v1508_v0 = vld [vmem:[%s1906_s2] sm:$0xff]   ;;  %s1683_s15 = scalar_select %p285_p10, %s1651_s28, 1  ;;  %vm331_vm0 = vcmask 130048   ;;  %v1583_v18 = vmov 0.0   ;;  %vm1585_vm1 = vmmov 0   ;;  %v1588_v21 = vmov 0  }
  0x14   : > { %1341 = vmatprep.subr.bf16.mxu0 %v1508_v0  ;;  %1351 = vmatprep.subr.bf16.mxu1 %v1583_v18  ;;  %667 = vst [vmem:[#allocation2] sm:$0xf] %v1588_v21  ;;  %668 = vst [vmem:[#allocation2 + $0x8] sm:$0xf] %v1588_v21  ;;  %v658_v22 = vld [vmem:[%s1908_s4] sm:$0xff]  ;;  %vm441_vm2 = vcmask 261120  }
  0x15   : > { %1342 = vmatpush3.bf16.msra.mxu0 %v1508_v0  ;;  %s1311_s16 = sshll.u32 %s1683_s15, 5  ;;  %1353 = vmatprep.mubr.msk.bf16.mxu1 %vm1585_vm1, %v1583_v18  ;;  %vm443_vm3 = vcmask 392192   ;;  %vm445_vm4 = vcmask 523264   ;;  %vm447_vm5 = vcmask 654336   ;;  %vm449_vm6 = vcmask 785408   ;;  %s1589_s28 = smov [#allocation3]  }
  0x16   : > { %s289_s19 = scalar_lea.vmem %s1904_s0, %s1311_s16  ;;  %1363 = vmatprep.subr.bf16.mxu0 %v1583_v18  ;;  %1507 = vset.pattern.permute.xlu0 %v1588_v21  ;;  %vm451_vm7 = vcmask 916480   ;;  %vm490_vm8 = vcmask 1043456   ;;  %vm486_vm9 = vcmask 64512   ;;  %s1271_s16 = sshll.u32 %s1683_s15, 2 }
  0x17   : > { %v1509_v1 = vld [vmem:[%s289_s19] sm:$0xff]   ;;  %v1510_v2 = vld [vmem:[%s289_s19 + $0x8] sm:$0xff]   ;;  %v1511_v3 = vld [vmem:[%s289_s19 + $0x10] sm:$0xff]  }
  0x18   : > { %1343 = vmatprep.mubr.msk.bf16.mxu0 %vm331_vm0, %v1509_v1  ;;  %v1512_v4 = vld [vmem:[%s289_s19 + $0x18] sm:$0xff]   ;;  %s293_s19 = scalar_lea.vmem %s1905_s1, %s1271_s16 }
  0x19   : > { %1344 = vmatmul.mubr.msk.bf16.vlgmr.msra.gmra.mxu0 %vm331_vm0, %v1510_v2 }
  0x1a   : > { %1347 = vmatprep.mubr.msk.bf16.mxu0 %vm331_vm0, %v1511_v3 }
  0x21   : > { %1348 = vmatmul.mubr.msk.bf16.gmra.mxu0 %vm331_vm0, %v1512_v4  ;;  %v1281_v4 = vld [vmem:[%s1907_s3 + $0x4] sm:$0xf] }
  0x22   : > { %1365 = vmatprep.mubr.msk.bf16.mxu0 %vm1585_vm1, %v1583_v18 }
  0xd9   : > { %v1693_v5 = vpop.f32.mrf.mxu0 }
  0xdb   : > { %v378_v6 = vpop.f32.mrf.mxu0 }
  0xdd   : > { %v1346_v7 = vpop.f32.mrf.mxu0 }
  0xde   : > { %v1472_v8 = vpack.i.bf16 %v1693_v5, %v1346_v7 }
  0xdf   : > { %v381_v9 = vpop.f32.mrf.mxu0 }
  0xe0   : > { %1473 = vrot.lane.b32.xlu1 %v1472_v8, %s1579_s20  ;;  %v1477_v10 = vpack.i.bf16 %v381_v9, %v378_v6  ;;  %v1482_v13 = vpack.i.bf16 %v381_v9, %v1693_v5 }
  0xe1   : > { %v1349_v11 = vpop.f32.mrf.mxu0 }
  0xe2   : > { %1478 = vrot.lane.b32.xlu0 %v1477_v10, %s1580_s21 }
  0xe3   : > { %v394_v12 = vpop.f32.mrf.mxu0 }
  0xe4   : > { %588 = vrot.lane.b32.xlu1 %v1346_v7, %s1581_s22  ;;  %v1487_v15 = vpack.i.bf16 %v1346_v7, %v394_v12 }
  0xe5   : > { %v1350_v14 = vpop.f32.mrf.mxu0 }
  0xe6   : > { %1483 = vrot.lane.b32.xlu0 %v1482_v13, %s1581_s22  ;;  %v1492_v17 = vpack.i.bf16 %v378_v6, %v1350_v14 }
  0xe7   : > { %v397_v16 = vpop.f32.mrf.mxu0 }
  0xe8   : > { %1488 = vrot.lane.b32.xlu1 %v1487_v15, %s1582_s23  ;;  %v1502_v19 = vpack.i.bf16 %v397_v16, %v1349_v11  ;;  %v1497_v20 = vpack.i.bf16 %v394_v12, %v397_v16  ;;  %v411_v15 = vld [vmem:[%s1907_s3] sm:$0xf] }
  0xea   : > { %1493 = vrot.lane.b32.xlu0 %v1492_v17, %s1584_s29 }
  0xec   : > { %1503 = vrot.lane.b32.xlu1 %v1502_v19, %s1586_s8 }
  0xee   : > { %1498 = vrot.lane.b32.xlu0 %v1497_v20, %s1587_s9 }
  0xf0   : > { %591 = vrot.lane.b32.xlu1 %v394_v12, %s1579_s20 }
  0xf2   : > { %433 = vrot.lane.b32.xlu0 %v1349_v11, %s1584_s29 }
  0xf4   : > { %594 = vrot.lane.b32.xlu1 %v397_v16, %s1582_s23  ;;  %v1284_v16 = vld [vmem:[%s1907_s3 + $0x8] sm:$0xf] }
  0xf6   : > { %437 = vrot.lane.b32.xlu0 %v1350_v14, %s1580_s21 }
  0xf8   : > { %600 = vrot.lane.b32.xlu1 %v1350_v14, %s1586_s8 }
  0xfa   : > { %597 = vrot.lane.b32.xlu0 %v1349_v11, %s1587_s9 }
  0xfe   : > { %661 = vperm.xlu0 %1507, %v658_v22  }
 0x152   : > { %v1474_v23 = vpop.permute.xlu1 %1473 }
 0x153   : > { %v1476_v35 = vunpack.i.h.bf16 %v1474_v23  ;;  %v1475_v36 = vunpack.i.l.bf16 %v1474_v23  ;;  %v1770_v23 = vld [vmem:[%s293_s19] sm:$0xf]  ;;  %s1191_s19 = scalar_lea.hbm %s1911_s7, %s1308_s13 }
 0x154   : > { %v1479_v24 = vpop.permute.xlu0 %1478 }
 0x155   : > { %v1480_v26 = vunpack.i.l.bf16 %v1479_v24  ;;  %v1481_v43 = vunpack.i.h.bf16 %v1479_v24 }
 0x156   : > { %v589_v25 = vpop.permute.xlu1 %588 }
 0x157   : > { %v478_v31 = vsel %vm331_vm0, %v1480_v26, %v381_v9 }
 0x158   : > { %v1484_v27 = vpop.permute.xlu0 %1483 }
 0x159   : > { %v1486_v28 = vunpack.i.h.bf16 %v1484_v27  ;;  %v1485_v29 = vunpack.i.l.bf16 %v1484_v27 }
 0x15a   : > { %v1489_v30 = vpop.permute.xlu1 %1488 }
 0x15b   : > { %v440_v32 = vsel %vm331_vm0, %v378_v6, %v1486_v28  ;;  %v479_v33 = vsel %vm441_vm2, %v478_v31, %v1485_v29  ;;  %v1491_v37 = vunpack.i.h.bf16 %v1489_v30  ;;  %v1490_v38 = vunpack.i.l.bf16 %v1489_v30 }
 0x15c   : > { %v1494_v34 = vpop.permute.xlu0 %1493  ;;  %v442_v41 = vsel %vm441_vm2, %v440_v32, %v1476_v35  ;;  %v480_v42 = vsel %vm443_vm3, %v479_v33, %v1475_v36  ;;  %v410_v29 = vunpack.c.l.bf16 %v1770_v23 }
 0x15d   : > { %v1496_v39 = vunpack.i.h.bf16 %v1494_v34  ;;  %v444_v47 = vsel %vm443_vm3, %v442_v41, %v1491_v37  ;;  %v481_v48 = vsel %vm445_vm4, %v480_v42, %v1490_v38  ;;  %v1495_v52 = vunpack.i.l.bf16 %v1494_v34 }
 0x15e   : > { %v1504_v40 = vpop.permute.xlu1 %1503 }
 0x15f   : > { %v603_v49 = vsel %vm331_vm0, %v1496_v39, %v1481_v43  ;;  %v1505_v50 = vunpack.i.l.bf16 %v1504_v40  ;;  %v1506_v53 = vunpack.i.h.bf16 %v1504_v40 }
 0x160   : > { %v1499_v44 = vpop.permute.xlu0 %1498  ;;  %v604_v58 = vsel %vm441_vm2, %v603_v49, %v1693_v5 }
 0x161   : > { %v1501_v45 = vunpack.i.h.bf16 %v1499_v44  ;;  %v1500_v46 = vunpack.i.l.bf16 %v1499_v44  ;;  %v605_v63 = vsel %vm443_vm3, %v604_v58, %v589_v25 }
 0x162   : > { %v592_v51 = vpop.permute.xlu1 %591 }
 0x163   : > { %v446_v54 = vsel %vm445_vm4, %v444_v47, %v1501_v45  ;;  %v482_v55 = vsel %vm447_vm5, %v481_v48, %v1500_v46  ;;  %v606_v6 = vsel %vm445_vm4, %v605_v63, %v592_v51  ;;  %v1169_v45 = vld [vmem:[%s1910_s6] sm:$0xff] }
 0x164   : > { %v434_v56 = vpop.permute.xlu0 %433  ;;  %v483_v57 = vsel %vm449_vm6, %v482_v55, %v1505_v50  ;;  %v448_v59 = vsel %vm447_vm5, %v446_v54, %v1506_v53 }
 0x165   : > { %v484_v60 = vsel %vm451_vm7, %v483_v57, %v1495_v52  ;;  %v450_v0 = vsel %vm449_vm6, %v448_v59, %v434_v56  ;;  %v1286_v52 = vld [vmem:[%s1909_s5 + $0x4] sm:$0xf]  ;;  %v672_v57 = vld [vmem:[%s1909_s5] sm:$0xf] }
 0x166   : > { %v485_v61 = vpack.c.bf16 %v484_v60, %v484_v60  ;;  %v595_v62 = vpop.permute.xlu1 %594 }
 0x167   : > { %v607_v7 = vsel %vm447_vm5, %v606_v6, %v595_v62  ;;  %v1291_v62 = vld [vmem:[%s1909_s5 + $0x8] sm:$0xf] }
 0x168   : > { %v438_v1 = vpop.permute.xlu0 %437  ;;  %v492_v2 = vsel %vm490_vm8, %v485_v61, 0 }
 0x169   : > { %v452_v3 = vsel %vm451_vm7, %v450_v0, %v438_v1  ;;  %1352 = vmatpush3.bf16.msra.mxu1 %v492_v2 }
 0x16a   : > { %v453_v5 = vpack.c.bf16 %v452_v3, %v452_v3  ;;  %1357 = vmatprep.subr.bf16.mxu1 %v1583_v18  ;;  %v601_v10 = vpop.permute.xlu1 %600 }
 0x16c   : > { %v598_v8 = vpop.permute.xlu0 %597  ;;  %1354 = vmatmul.mubr.msk.bf16.vlgmr.msra.gmra.mxu1 %vm486_vm9, %v1281_v4  ;;  %v538_v9 = vsel %vm490_vm8, %v453_v5, 0  ;;  %v1293_v4 = vld [vmem:[%s1909_s5 + $0xc] sm:$0xf] }
 0x16d   : > { %v608_v11 = vsel %vm449_vm6, %v607_v7, %v598_v8  ;;  %1358 = vmatpush3.bf16.msra.mxu1 %v538_v9  ;;  %1359 = vmatprep.mubr.msk.bf16.mxu1 %vm1585_vm1, %v1583_v18  ;;  %v1295_v9 = vld [vmem:[%s1909_s5 + $0x10] sm:$0xf] }
 0x16e   : > { %v609_v12 = vsel %vm451_vm7, %v608_v11, %v601_v10  ;;  %1369 = vmatprep.subr.bf16.mxu1 %v1583_v18 }
 0x16f   : > { %v610_v13 = vpack.c.bf16 %v609_v12, %v609_v12 }
 0x171   : > { %v615_v14 = vsel %vm490_vm8, %v610_v13, 0 }
 0x172   : > { %1364 = vmatpush3.bf16.msra.mxu0 %v615_v14  ;;  %v1297_v14 = vld [vmem:[%s1909_s5 + $0x14] sm:$0xf] }
 0x173   : > { %1375 = vmatprep.subr.bf16.mxu0 %v1583_v18 }
 0x174   : > { %1360 = vmatmul.mubr.msk.bf16.vlgmr.msra.gmra.mxu1 %vm486_vm9, %v411_v15 }
 0x175   : > { %1366 = vmatmul.mubr.msk.bf16.vlgmr.msra.gmra.mxu0 %vm486_vm9, %v1284_v16  ;;  %1371 = vmatprep.mubr.msk.bf16.mxu1 %vm1585_vm1, %v1583_v18 }
 0x176   : > { %1377 = vmatprep.mubr.msk.bf16.mxu0 %vm1585_vm1, %v1583_v18 }
 0x179   : > { %v662_v27 = vpop.permute.xlu0 %661 }
 0x22c   : > { %v528_v17 = vpop.f32.mrf.mxu1 }
 0x22e   : > { %v1355_v19 = vpop.f32.mrf.mxu1 }
 0x22f   : > { %v1301_v19 = vld [vmem:[%s1909_s5 + $0x18] sm:$0xf] }
 0x230   : > { %v531_v20 = vpop.f32.mrf.mxu1 }
 0x232   : > { %v1356_v21 = vpop.f32.mrf.mxu1 }
 0x234   : > { %v574_v22 = vpop.f32.mrf.mxu1 }
 0x235   : > { %v575_v24 = vadd.f32 %v574_v22, %v528_v17  ;;  %v651_v25 = vpop.f32.mrf.mxu0 }
 0x236   : > { %v1361_v26 = vpop.f32.mrf.mxu1 }
 0x237   : > { %v657_v28 = vadd.f32 %v651_v25, %v575_v24  ;;  %v1367_v30 = vpop.f32.mrf.mxu0  ;;  %v1303_v25 = vld [vmem:[%s1909_s5 + $0x1c] sm:$0xf]  ;;  %v1305_v26 = vld [vmem:[%s1909_s5 + $0x20] sm:$0xf] }
 0x238   : > { %v577_v31 = vpop.f32.mrf.mxu1 }
 0x239   : > { %v664_v32 = vadd.f32 %v662_v27, %v657_v28  ;;  %v654_v33 = vpop.f32.mrf.mxu0 }
 0x23a   : > { %v1362_v34 = vpop.f32.mrf.mxu1 }
 0x23b   : > { %v665_v35 = vadd.f32 %v664_v32, %v410_v29  ;;  %v1368_v36 = vpop.f32.mrf.mxu0 }
 0x23d   : > { %v666_v37 = vmax.f32 %v665_v35, 0.0 }
 0x23f   : > { %v669_v38 = vpack.c.bf16 %v666_v37, %v666_v37 }
 0x241   : > { %670 = vst [vmem:[#allocation2 + $0x4] sm:$0xf] %v669_v38 }
 0x248   : > { %v671_v39 = vld [vmem:[#allocation2] sm:$0xff] }
 0x249   : > { %v1287_v40 = vcombine.low %v671_v39, %v671_v39  ;;  %v1288_v41 = vcombine.high %v671_v39, %v671_v39  ;;  %v944_v42 = vld [vmem:[#allocation2 + $0x4] sm:$0xff] }
 0x24a   : > { %v1298_v43 = vcombine.low %v944_v42, %v944_v42  ;;  %v1299_v44 = vcombine.high %v944_v42, %v944_v42  ;;  %v894_v63 = vld [vmem:[#allocation2 + $0x4] sm:$0xf] }
 0x24b   : > { %732 = vrot.lane.b32.xlu0 %v1287_v40, %s1587_s9  ;;  %680 = vrot.lane.b32.xlu1 %v1287_v40, %s1582_s23  ;;  %v901_v3 = vsel %vm490_vm8, %v894_v63, 0 }
 0x24f   : > { %786 = vrot.lane.b32.xlu0 %v1287_v40, %s1579_s20  ;;  %682 = vrot.lane.b32.xlu1 %v1288_v41, %s1582_s23 }
 0x253   : > { %841 = vrot.lane.b32.xlu0 %v1287_v40, %s1581_s22  ;;  %734 = vrot.lane.b32.xlu1 %v1288_v41, %s1587_s9 }
 0x257   : > { %952 = vrot.lane.b32.xlu0 %v1298_v43, %s1580_s21  ;;  %788 = vrot.lane.b32.xlu1 %v1288_v41, %s1579_s20  ;;  %s1521_s20 = sshll.u32 %s1589_s28, 4  ;;  %s1522_s20 = int_to_ptr.vmem [resolvable:$false] %s1521_s20 }
 0x25b   : > { %1007 = vrot.lane.b32.xlu0 %v1298_v43, %s1584_s29  ;;  %843 = vrot.lane.b32.xlu1 %v1288_v41, %s1581_s22 }
 0x25f   : > { %1062 = vrot.lane.b32.xlu0 %v1298_v43, %s1586_s8  ;;  %954 = vrot.lane.b32.xlu1 %v1299_v44, %s1580_s21  ;;  %s1523_s21 = scalar_lea.vmem %s1522_s20, 256 }
 0x263   : > { %1117 = vrot.lane.b32.xlu0 %v1298_v43, %s1587_s9  ;;  %1009 = vrot.lane.b32.xlu1 %v1299_v44, %s1584_s29 }
 0x267   : > { %1172 = vperm.xlu0 %1507, %v1169_v45   ;;  %1064 = vrot.lane.b32.xlu1 %v1299_v44, %s1586_s8  ;;  %s282_s8 = sand.u32 1, %s1569_s25  }
 0x268   : > { %s1180_s15 = scalar_lea.sflag [#allocation4], %s282_s8 }
 0x26b   : > { %1119 = vrot.lane.b32.xlu1 %v1299_v44, %s1587_s9  ;;  %s1268_s9 = sshll.u32 %s282_s8, 3 }
 0x26c   : > { %s284_s14 = scalar_lea.vmem [#allocation3], %s1268_s9 }
 0x26d   : > { %s1193_s16 = sshll.u32 %s284_s14, 4  ;;  %s1194_s16 = int_to_ptr.vmem [resolvable:$true] %s1193_s16 }
 0x26e   : > { %s1517_s23 = scalar_lea.vmem %s1194_s16, 128  ;;  %p1524_p0 = scmp.lt.s32.totalorder %s1194_s16, %s1522_s20 }
 0x26f   : > { %p1518_p11 = scmp.ne.s32.totalorder %s1194_s16, %s1517_s23  ;;  %p1525_p1 = scmp.lt.s32.totalorder %s1523_s21, %s1517_s23 }
 0x271   : > { %p1519_p12 = pnand %p1518_p11, %p1668_p5  ;;  %p1526_p2 = por %p1525_p1, %p1524_p0 }
 0x273   : > { %p1520_p13 = pneg %p1519_p12 }
 0x275   : > { %p1527_p3 = pnand %p1526_p2, %p1520_p13 }
 0x2bd   : > { %v733_v46 = vpop.permute.xlu0 %732  ;;  %v681_v47 = vpop.permute.xlu1 %680 }
 0x2c1   : > { %v787_v48 = vpop.permute.xlu0 %786  ;;  %v683_v49 = vpop.permute.xlu1 %682 }
 0x2c2   : > { %v685_v50 = vsel %vm443_vm3, %v681_v47, %v683_v49 }
 0x2c3   : > { %v690_v51 = vsel %vm490_vm8, %v685_v50, 0 }
 0x2c4   : > { %1370 = vmatpush3.bf16.msra.mxu1 %v690_v51 }
 0x2c5   : > { %v842_v53 = vpop.permute.xlu0 %841  ;;  %v735_v54 = vpop.permute.xlu1 %734  ;;  %1381 = vmatprep.subr.bf16.mxu1 %v1583_v18 }
 0x2c6   : > { %v737_v55 = vsel %vm445_vm4, %v733_v46, %v735_v54 }
 0x2c7   : > { %v742_v56 = vsel %vm490_vm8, %v737_v55, 0  ;;  %1372 = vmatmul.mubr.msk.bf16.vlgmr.msra.gmra.mxu1 %vm486_vm9, %v1286_v52 }
 0x2c8   : > { %1376 = vmatpush3.bf16.msra.mxu0 %v742_v56  ;;  %1383 = vmatprep.mubr.msk.bf16.mxu1 %vm1585_vm1, %v1583_v18 }
 0x2c9   : > { %v789_v58 = vpop.permute.xlu1 %788  ;;  %1387 = vmatprep.subr.bf16.mxu0 %v1583_v18  ;;  %v953_v60 = vpop.permute.xlu0 %952 }
 0x2ca   : > { %v791_v59 = vsel %vm441_vm2, %v787_v48, %v789_v58 }
 0x2cb   : > { %v796_v61 = vsel %vm490_vm8, %v791_v59, 0  ;;  %1378 = vmatmul.mubr.msk.bf16.vlgmr.msra.gmra.mxu0 %vm486_vm9, %v672_v57 }
 0x2cc   : > { %1382 = vmatpush3.bf16.msra.mxu1 %v796_v61  ;;  %1389 = vmatprep.mubr.msk.bf16.mxu0 %vm1585_vm1, %v1583_v18 }
 0x2cd   : > { %v844_v0 = vpop.permute.xlu1 %843  ;;  %1393 = vmatprep.subr.bf16.mxu1 %v1583_v18  ;;  %v1008_v5 = vpop.permute.xlu0 %1007 }
 0x2ce   : > { %v846_v1 = vsel %vm331_vm0, %v842_v53, %v844_v0 }
 0x2cf   : > { %v851_v2 = vsel %vm490_vm8, %v846_v1, 0  ;;  %1384 = vmatmul.mubr.msk.bf16.vlgmr.msra.gmra.mxu1 %vm486_vm9, %v1291_v62 }
 0x2d0   : > { %1388 = vmatpush3.bf16.msra.mxu0 %v851_v2  ;;  %1394 = vmatpush3.bf16.msra.mxu1 %v901_v3 }
 0x2d1   : > { %v955_v6 = vpop.permute.xlu1 %954  ;;  %1399 = vmatprep.subr.bf16.mxu0 %v1583_v18  ;;  %1395 = vmatprep.mubr.msk.bf16.mxu1 %vm1585_vm1, %v1583_v18  ;;  %v1063_v12 = vpop.permute.xlu0 %1062 }
 0x2d2   : > { %v957_v7 = vsel %vm451_vm7, %v953_v60, %v955_v6  ;;  %1405 = vmatprep.subr.bf16.mxu1 %v1583_v18 }
 0x2d3   : > { %v962_v8 = vsel %vm490_vm8, %v957_v7, 0  ;;  %1390 = vmatmul.mubr.msk.bf16.vlgmr.msra.gmra.mxu0 %vm486_vm9, %v1293_v4 }
 0x2d4   : > { %1400 = vmatpush3.bf16.msra.mxu0 %v962_v8  ;;  %1401 = vmatprep.mubr.msk.bf16.mxu0 %vm1585_vm1, %v1583_v18 }
 0x2d5   : > { %v1010_v10 = vpop.permute.xlu1 %1009  ;;  %1411 = vmatprep.subr.bf16.mxu0 %v1583_v18  ;;  %v1118_v20 = vpop.permute.xlu0 %1117 }
 0x2d6   : > { %v1012_v11 = vsel %vm449_vm6, %v1008_v5, %v1010_v10 }
 0x2d7   : > { %v1017_v13 = vsel %vm490_vm8, %v1012_v11, 0  ;;  %1396 = vmatmul.mubr.msk.bf16.vlgmr.msra.gmra.mxu1 %vm486_vm9, %v1295_v9 }
 0x2d8   : > { %1406 = vmatpush3.bf16.msra.mxu1 %v1017_v13  ;;  %1407 = vmatprep.mubr.msk.bf16.mxu1 %vm1585_vm1, %v1583_v18 }
 0x2d9   : > { %v1065_v15 = vpop.permute.xlu1 %1064  ;;  %1417 = vmatprep.subr.bf16.mxu1 %v1583_v18 }
 0x2da   : > { %v1067_v16 = vsel %vm447_vm5, %v1063_v12, %v1065_v15 }
 0x2db   : > { %v1072_v17 = vsel %vm490_vm8, %v1067_v16, 0  ;;  %1402 = vmatmul.mubr.msk.bf16.vlgmr.msra.gmra.mxu0 %vm486_vm9, %v1297_v14 }
 0x2dc   : > { %1412 = vmatpush3.bf16.msra.mxu0 %v1072_v17  ;;  %1413 = vmatprep.mubr.msk.bf16.mxu0 %vm1585_vm1, %v1583_v18 }
 0x2dd   : > { %v1120_v21 = vpop.permute.xlu1 %1119 }
 0x2de   : > { %v1121_v22 = vsel %vm445_vm4, %v1118_v20, %v1120_v21 }
 0x2df   : > { %v1126_v24 = vsel %vm490_vm8, %v1121_v22, 0  ;;  %1408 = vmatmul.mubr.msk.bf16.vlgmr.msra.gmra.mxu1 %vm486_vm9, %v1301_v19 }
 0x2e0   : > { %1418 = vmatpush3.bf16.msra.mxu1 %v1126_v24  ;;  %1419 = vmatprep.mubr.msk.bf16.mxu1 %vm1585_vm1, %v1583_v18 }
 0x2e2   : > { %v1173_v2 = vpop.permute.xlu0 %1172 }
 0x2e3   : > { %1414 = vmatmul.mubr.msk.bf16.vlgmr.msra.gmra.mxu0 %vm486_vm9, %v1303_v25 }
 0x2e7   : > { %1420 = vmatmul.mubr.msk.bf16.vlgmr.msra.gmra.mxu1 %vm486_vm9, %v1305_v26 }
 0x387   : > { %v726_v27 = vpop.f32.mrf.mxu1 }
 0x389   : > { %v1373_v28 = vpop.f32.mrf.mxu1 }
 0x38b   : > { %v729_v30 = vpop.f32.mrf.mxu1  ;;  %v778_v31 = vpop.f32.mrf.mxu0 }
 0x38c   : > { %v779_v45 = vadd.f32 %v778_v31, %v726_v27 }
 0x38d   : > { %v1374_v32 = vpop.f32.mrf.mxu1  ;;  %v1379_v33 = vpop.f32.mrf.mxu0 }
 0x38f   : > { %v781_v34 = vpop.f32.mrf.mxu0  ;;  %v832_v35 = vpop.f32.mrf.mxu1 }
 0x390   : > { %v838_v48 = vadd.f32 %v832_v35, %v779_v45 }
 0x391   : > { %v1380_v36 = vpop.f32.mrf.mxu0  ;;  %v1385_v37 = vpop.f32.mrf.mxu1 }
 0x393   : > { %v835_v38 = vpop.f32.mrf.mxu1  ;;  %v887_v18 = vpop.f32.mrf.mxu0 }
 0x394   : > { %v893_v51 = vadd.f32 %v887_v18, %v838_v48 }
 0x395   : > { %v1386_v39 = vpop.f32.mrf.mxu1  ;;  %v1391_v40 = vpop.f32.mrf.mxu0 }
 0x397   : > { %v890_v41 = vpop.f32.mrf.mxu0  ;;  %v937_v42 = vpop.f32.mrf.mxu1 }
 0x398   : > { %v943_v54 = vadd.f32 %v937_v42, %v893_v51 }
 0x399   : > { %v1392_v43 = vpop.f32.mrf.mxu0  ;;  %v1397_v44 = vpop.f32.mrf.mxu1 }
 0x39b   : > { %v940_v46 = vpop.f32.mrf.mxu1  ;;  %v998_v47 = vpop.f32.mrf.mxu0 }
 0x39c   : > { %v1004_v57 = vadd.f32 %v998_v47, %v943_v54 }
 0x39d   : > { %v1398_v49 = vpop.f32.mrf.mxu1  ;;  %v1403_v50 = vpop.f32.mrf.mxu0 }
 0x39f   : > { %v1001_v52 = vpop.f32.mrf.mxu0  ;;  %v1053_v53 = vpop.f32.mrf.mxu1 }
 0x3a0   : > { %v1059_v60 = vadd.f32 %v1053_v53, %v1004_v57 }
 0x3a1   : > { %v1404_v55 = vpop.f32.mrf.mxu0  ;;  %v1409_v56 = vpop.f32.mrf.mxu1 }
 0x3a3   : > { %v1056_v58 = vpop.f32.mrf.mxu1  ;;  %v1108_v59 = vpop.f32.mrf.mxu0 }
 0x3a4   : > { %v1114_v63 = vadd.f32 %v1108_v59, %v1059_v60 }
 0x3a5   : > { %v1410_v61 = vpop.f32.mrf.mxu1  ;;  %v1415_v62 = vpop.f32.mrf.mxu0 }
 0x3a7   : > { %v1162_v0 = vpop.f32.mrf.mxu1  ;;  %v1111_v1 = vpop.f32.mrf.mxu0 }
 0x3a8   : > { %v1168_v3 = vadd.f32 %v1162_v0, %v1114_v63 }
 0x3a9   : > { %v1421_v4 = vpop.f32.mrf.mxu1  ;;  %v1416_v5 = vpop.f32.mrf.mxu0 }
 0x3aa   : > { %v1175_v6 = vadd.f32 %v1173_v2, %v1168_v3 }
 0x3ab   : > { %v1165_v7 = vpop.f32.mrf.mxu1 }
 0x3ac   : > { %v1176_v8 = vadd.f32 %v1175_v6, %v410_v29 }
 0x3ad   : > { %v1422_v9 = vpop.f32.mrf.mxu1 }
 0x3ae   : > { %v1177_v10 = vmax.f32 %v1176_v8, 0.0 }
 0x3b0   : > { %1178 = vst [vmem:[%s284_s14] sm:$0xff] %v1177_v10 }
 0x3b1   : > { %1530 = shalt.err (!%p1527_p3)
}
 0x3b2   : > { %s1531_s22 = scalar_lea.hbm %s1191_s19, 128  ;;  %s1535_s9 = scalar_lea.hbm %s1911_s7, 256 }
 0x3b3   : > { %p1532_p4 = scmp.ne.s32.totalorder %s1191_s19, %s1531_s22  ;;  %p1536_p9 = scmp.lt.s32.totalorder %s1191_s19, %s1911_s7 }
 0x3b4   : > { %p1537_p10 = scmp.lt.s32.totalorder %s1535_s9, %s1531_s22 }
 0x3b5   : > { %p1533_p7 = pnand %p1532_p4, %p1668_p5 }
 0x3b6   : > { %p1538_p11 = por %p1537_p10, %p1536_p9 }
 0x3b7   : > { %p1534_p8 = pneg %p1533_p7 }
 0x3b9   : > { %p1539_p12 = pnand %p1538_p11, %p1534_p8 }
 0x3bb   : > { %1542 = shalt.err (!%p1539_p12)
}
 0x3bc   : > { %1423 = dma.vmem_to_hbm [thread:$0]  (%p1668_p5), %s1194_s16, 128, %s1191_s19, %s1180_s15  }
 0x3bd PF: > { %p1429_p13 = scmp.ge.s32.totalorder %s1577_s27, 2  ;;  %s1205_s17 = sand.u32 1, %s1565_s24  }
 0x3be   : > { %s1206_s18 = scalar_lea.sflag [#allocation4], %s1205_s17 }
 0x3bf   : > { %p1426_p0 = pnand %p1429_p13, %p1672_p6 }
 0x3c1   : > { %p1427_p1 = pneg %p1426_p0 }
 0x3c3   : > { %1560 = dma.done.wait (%p1427_p1), %s1206_s18, 128  }
 0x3c4   : > { %1562 = vsyncadd (%p1427_p1), %s1206_s18, 4294967168  ;;  %p17_p2 = scmp.ge.s32.totalorder %s1655_s30, 4   ;;  %s1914_s24 = smov %s1569_s25 }
 0x3c5   : > { %s1915_s25 = smov %s1573_s26  ;;  %s1916_s26 = smov %s1666_s10 }
 0x3c6   : > { %s1917_s27 = smov %s1655_s30  ;;  %19 = sbr.rel (!%p17_p2) target bundleno = 3 (0x3), region = 96 }
 0x3cb   :  { %1211 = vsyncpa [#allocation4], 1 }
 0x3cc   :  { %1213 = vsyncpa [#allocation4 + $0x1], 1 }

</bundles_post_ra>
